<compile_context>
chip_gen: v5e
topology: v5e:2x2
jax: 0.10.0
libtpu: 0.0.40
codegen_flags: <defaults>
</compile_context>

<pallas_src>
import functools
import math

import jax
import jax.numpy as jnp
from jax import lax
from jax.experimental import pallas as pl
from jax.experimental.pallas import tpu as pltpu


def _round_up(x, m):
    return ((x + m - 1) // m) * m


# ---------------------------------------------------------------------------
# Path 1: small table resident in VMEM, on-chip gather via one-hot MXU matmul
# ---------------------------------------------------------------------------
def _vmem_table_kernel(ids_ref, table_ref, out_ref, *, scale):
    """ids_ref: (tblk, 1) int32 | table_ref: (V, D) | out_ref: (tblk, D)."""
    tblk = out_ref.shape[0]
    V = table_ref.shape[0]
    ids = ids_ref[...]                                        # (tblk, 1)
    cols = lax.broadcasted_iota(jnp.int32, (tblk, V), 1)      # vocab ids on lanes
    onehot = (ids == cols).astype(table_ref.dtype)            # (tblk, V)
    emb = jnp.dot(onehot, table_ref[...],
                  preferred_element_type=jnp.float32)          # (tblk, D) on MXU
    out_ref[...] = (emb * scale).astype(out_ref.dtype)


# ---------------------------------------------------------------------------
# Path 2: table in HBM, double-buffered per-row DMA gather across grid steps
# ---------------------------------------------------------------------------
def _hbm_gather_kernel(ids_ref, table_hbm, out_ref, buf, sem, *, tblk, scale):
    """ids_ref:   (T_pad,)      int32 SMEM (scalar prefetch)
       table_hbm: (V, D)        HBM (memory_space=pl.ANY)
       out_ref:   (tblk, D)     VMEM output tile
       buf:       (2, tblk, D)  VMEM landing buffer (double-buffered)
       sem:       (2,)          DMA semaphores (one shared per slot)."""
    i = pl.program_id(0)
    n = pl.num_programs(0)
    slot = i & 1

    def issue(block_idx, dst_slot):
        base = block_idx * tblk

        def body(r, carry):
            row = ids_ref[base + r]
            pltpu.make_async_copy(
                table_hbm.at[pl.ds(row, 1)],            # (1, D) HBM source row
                buf.at[dst_slot, pl.ds(r, 1)],          # (1, D) VMEM dest row
                sem.at[dst_slot],                       # shared slot semaphore
            ).start()
            return carry

        # Rolled issue loop (DMA issue is ~1 descriptor per bundle anyway).
        lax.fori_loop(0, tblk, body, 0, unroll=8)

    # Prime slot 0 on the very first grid step.
    @pl.when(i == 0)
    def _():
        issue(0, 0)

    # Prefetch the NEXT block into the other slot before waiting on this one.
    @pl.when(i + 1 < n)
    def _():
        issue(i + 1, 1 - slot)

    # One aggregated wait sized to the whole (tblk, D) slot: the slot semaphore
    # counts bytes, and exactly tblk rows x D x itemsize were issued into it.
    pltpu.make_async_copy(
        table_hbm.at[pl.ds(0, tblk)],   # same total size as dst (V >= tblk here)
        buf.at[slot],
        sem.at[slot],
    ).wait()

    # Fold the sqrt(D) scaling into the single lane-dense store.
    out_ref[...] = (buf[slot] * scale).astype(out_ref.dtype)


# ---------------------------------------------------------------------------
# Wrapper
# ---------------------------------------------------------------------------
def _embed_chunk(ids_c, table, *, tblk, scale, use_vmem_table):
    Tc = ids_c.shape[0]
    V, D = table.shape
    T_pad = _round_up(Tc, tblk)
    if T_pad != Tc:
        ids_c = jnp.pad(ids_c, (0, T_pad - Tc))
    n_blocks = T_pad // tblk

    if use_vmem_table:
        kernel = functools.partial(_vmem_table_kernel, scale=scale)
        out = pl.pallas_call(
            kernel,
            out_shape=jax.ShapeDtypeStruct((T_pad, D), table.dtype),
            grid_spec=pltpu.PrefetchScalarGridSpec(
                num_scalar_prefetch=0,
                grid=(n_blocks,),
                in_specs=[
                    pl.BlockSpec((tblk, 1), lambda i: (i, 0)),   # ids block
                    pl.BlockSpec((V, D), lambda i: (0, 0)),      # table resident
                ],
                out_specs=pl.BlockSpec((tblk, D), lambda i: (i, 0)),
            ),
            compiler_params=pltpu.CompilerParams(
                dimension_semantics=("parallel",)),
        )(ids_c.reshape(T_pad, 1), table)
    else:
        kernel = functools.partial(_hbm_gather_kernel, tblk=tblk, scale=scale)
        out = pl.pallas_call(
            kernel,
            out_shape=jax.ShapeDtypeStruct((T_pad, D), table.dtype),
            grid_spec=pltpu.PrefetchScalarGridSpec(
                num_scalar_prefetch=1,                         # ids -> SMEM
                grid=(n_blocks,),
                in_specs=[pl.BlockSpec(memory_space=pl.ANY)],  # table stays in HBM
                out_specs=pl.BlockSpec((tblk, D), lambda i, ids: (i, 0)),
                scratch_shapes=[
                    pltpu.VMEM((2, tblk, D), table.dtype),     # double buffer
                    pltpu.SemaphoreType.DMA((2,)),             # one sem per slot
                ],
            ),
            # Cross-step prefetch carries scratch state -> must stay "arbitrary".
            compiler_params=pltpu.CompilerParams(
                dimension_semantics=("arbitrary",)),
        )(ids_c, table)
    return out[:Tc]


def embedding_forward(ids, table, *, tblk=None, use_vmem_table=None,
                      max_tokens_per_call=1 << 16):
    """ids: integer token ids of any shape, table: (V, D) -> ids.shape + (D,)."""
    lead = ids.shape
    V, D = table.shape
    T = int(math.prod(lead)) if lead else 1
    itemsize = jnp.dtype(table.dtype).itemsize
    scale = math.sqrt(float(D))  # matches torch.sqrt(torch.tensor(embed_dim))

    # Path selection: keep the on-chip one-hot gather to small vocabularies
    # where its T*V*D MXU cost is negligible and the table trivially fits VMEM
    # on every generation (incl. v7x's 64 MiB).
    table_bytes = V * D * itemsize
    if use_vmem_table is None:
        use_vmem_table = (table_bytes <= 4 * 1024 * 1024) and (V <= 2048)

    # Token-block size from VMEM budget: 2x landing + 2x output double buffer
    # ~= 4 * tblk * D * itemsize, kept under ~16 MiB (safe for v7x's 32 MiB
    # scoped default), capped at 512 to amortize per-step pipeline overhead.
    if tblk is None:
        budget = 16 * 1024 * 1024
        tblk = budget // max(1, 4 * D * itemsize)
        tblk = max(8, min(512, int(tblk)))
    tblk = max(8, _round_up(int(tblk), 8))
    tblk = min(tblk, _round_up(T, 8))
    if use_vmem_table:
        # Bound the (tblk, V) one-hot intermediate to ~2 MiB.
        cap = max(8, ((2 * 1024 * 1024) // max(1, V * 4)) // 8 * 8)
        tblk = min(tblk, cap)
    else:
        # Aggregated-wait descriptor slices tblk rows of the table: need V >= tblk.
        tblk = max(8, min(tblk, (V // 8) * 8)) if V >= 8 else tblk

    # Flatten, clamp (guards the DMA / one-hot against out-of-range ids), pad.
    # Note: torch.nn.Embedding raises on out-of-range ids; we clamp instead.
    ids_flat = jnp.clip(ids.reshape(T).astype(jnp.int32), 0, V - 1)

    # Chunk so the scalar-prefetched id array keeps a bounded SMEM footprint.
    chunk = max(tblk, (max_tokens_per_call // tblk) * tblk)
    outs = []
    for start in range(0, T, chunk):
        ids_c = ids_flat[start:start + chunk]
        outs.append(_embed_chunk(ids_c, table, tblk=tblk, scale=scale,
                                 use_vmem_table=use_vmem_table))
    out = outs[0] if len(outs) == 1 else jnp.concatenate(outs, axis=0)
    return out.reshape(*lead, D)


def init_embedding_table(key, vocab_size, embed_dim, pad_idx=0):
    """Deterministic nn.Embedding-style init: N(0,1), padding row zeroed."""
    table = jax.random.normal(key, (vocab_size, embed_dim), dtype=jnp.float32)
    table = table.at[pad_idx].set(0.0)
    return table


if __name__ == "__main__":
    # Small shapes consistent with the module's forward:
    vocab_size = 256
    embed_dim = 128
    batch, seq = 2, 8
    pad_idx = 0

    key = jax.random.PRNGKey(0)
    k_tab, k_ids = jax.random.split(key)

    table = init_embedding_table(k_tab, vocab_size, embed_dim, pad_idx=pad_idx)
    ids = jax.random.randint(k_ids, (batch, seq), 0, vocab_size, dtype=jnp.int32)
    ids = ids.at[0, 0].set(pad_idx)  # make sure a padding token appears

    ref = jnp.take(table, ids, axis=0) * jnp.float32(math.sqrt(float(embed_dim)))

    # Auto path: small table -> VMEM-resident fast path.
    out_fast = jax.block_until_ready(embedding_forward(ids, table))
    assert out_fast.shape == (batch, seq, embed_dim)
    assert out_fast.dtype == jnp.float32
    assert jnp.allclose(out_fast, ref, atol=1e-5, rtol=1e-5)

    # Forced HBM row-gather path (double-buffered DMA), small tblk so the
    # cross-step prefetch / slot-swap logic actually executes (2 grid steps).
    out_dma = jax.block_until_ready(
        embedding_forward(ids, table, use_vmem_table=False, tblk=8))
    assert out_dma.shape == (batch, seq, embed_dim)
    assert jnp.allclose(out_dma, ref, atol=1e-5, rtol=1e-5)

    print("KERNEL_OK")
</pallas_src>

<mosaic_0001>
module attributes {stable_mosaic.version = 11 : i64} {
  func.func @_vmem_table_kernel(%arg0: i32, %arg1: memref<16x1xi32, #tpu.memory_space<vmem>>, %arg2: memref<256x128xf32, #tpu.memory_space<vmem>>, %arg3: memref<16x128xf32, #tpu.memory_space<vmem>>) attributes {dimension_semantics = [#tpu.dimension_semantics<parallel>], iteration_bounds = array<i64: 1>, scalar_prefetch = 0 : i64, scratch_operands = 0 : i64, tpu.core_type = #tpu.core_type<tc>, window_params = [{transform_indices = @transform_0, window_bounds = array<i64: 16, 1>}, {pipeline_mode = #tpu.pipeline_mode<synchronous>, transform_indices = @transform_1, window_bounds = array<i64: 256, 128>}, {transform_indices = @transform_2, window_bounds = array<i64: 16, 128>}]} {
    %c0 = arith.constant 0 : index
    %c0_0 = arith.constant 0 : index
    %0 = vector.load %arg1[%c0, %c0_0] : memref<16x1xi32, #tpu.memory_space<vmem>>, vector<16x1xi32>
    %1 = tpu.iota {dimensions = array<i32: 1>} : vector<16x256xi32>
    %2 = vector.broadcast %0 : vector<16x1xi32> to vector<16x256xi32>
    %3 = arith.cmpi eq, %2, %1 : vector<16x256xi32>
    %4 = arith.extui %3 : vector<16x256xi1> to vector<16x256xi32>
    %5 = arith.sitofp %4 : vector<16x256xi32> to vector<16x256xf32>
    %c0_1 = arith.constant 0 : index
    %c0_2 = arith.constant 0 : index
    %6 = vector.load %arg2[%c0_1, %c0_2] : memref<256x128xf32, #tpu.memory_space<vmem>>, vector<256x128xf32>
    %cst = arith.constant dense<0.000000e+00> : vector<16x128xf32>
    %7 = tpu.matmul %5, %6, %cst {dimension_numbers = #tpu.dot_dimension_numbers<[1], [0], [0], [1], [0, 0, 1, 1], [], []>} : vector<16x256xf32>, vector<256x128xf32>, vector<16x128xf32> -> vector<16x128xf32>
    %cst_3 = arith.constant 11.3137083 : f32
    %8 = vector.broadcast %cst_3 : f32 to vector<16x128xf32>
    %9 = arith.mulf %7, %8 : vector<16x128xf32>
    %c0_4 = arith.constant 0 : index
    %c0_5 = arith.constant 0 : index
    %10 = vector.load %arg3[%c0_4, %c0_5] : memref<16x128xf32, #tpu.memory_space<vmem>>, vector<16x128xf32>
    tpu.vector_store %arg3[%c0_4, %c0_5], %9 {strides = array<i32>} : memref<16x128xf32, #tpu.memory_space<vmem>>, vector<16x128xf32>,
    return
  }
  func.func @transform_0(%arg0: i32) -> (i32, i32) {
    %c0_i32 = arith.constant 0 : i32
    %c0_i32_0 = arith.constant 0 : i32
    return %arg0, %c0_i32 : i32, i32
  }
  func.func @transform_1(%arg0: i32) -> (i32, i32) {
    %c0_i32 = arith.constant 0 : i32
    %c0_i32_0 = arith.constant 0 : i32
    %c0_i32_1 = arith.constant 0 : i32
    return %c0_i32, %c0_i32_0 : i32, i32
  }
  func.func @transform_2(%arg0: i32) -> (i32, i32) {
    %c0_i32 = arith.constant 0 : i32
    %c0_i32_0 = arith.constant 0 : i32
    return %arg0, %c0_i32 : i32, i32
  }
}

</mosaic_0001>

<bundles_post_ra>
// kernel: tpu_custom_call.1
= control target key start
LH: loop header
LB: loop body
LE: loop exit
PB: predicated region body
PF: predicated region fallthrough
CT: control target
= control target key end

     0   :  { %7 = vsyncpa [#allocation3], 0  ;;  %s290_s0 = inlined_call_operand.vmem [shape: s32[16,1], index: 0, kind: input, shape index: {}]   ;;  %s291_s1 = inlined_call_operand.hbm [shape: f32[256,128], index: 1, kind: input, shape index: {}]   ;;  %s292_s2 = inlined_call_operand.hbm [shape: f32[16,128], index: 2, kind: output, shape index: {}]  }
   0x1   :  { %8 = vsyncpa [#allocation4], 0  ;;  %s15_s11 = sshll.u32 %s291_s1, 4  ;;  %s251_s12 = smov [#allocation2]   ;;  %s16_s11 = int_to_ptr.hbm [resolvable:$true] %s15_s11 }
   0x2   :  { %s17_s13 = sshll.u32 %s251_s12, 4  ;;  %s252_s14 = smov 128   ;;  %s18_s13 = int_to_ptr.vmem [resolvable:$true] %s17_s13 }
   0x3   :  { %s253_s15 = smov 8  }
   0x4   :  { %23 = dma.hbm_to_vmem [thread:$0]  %s16_s11, 4096, %s18_s13, [#allocation3], %s252_s14, %s252_s14, %s253_s15  }
   0x5   :  { %247 = dma.done.wait [#allocation3], 4096  }
   0x6   :  { %248 = vsyncadd [#allocation3], 4294963200  ;;  %v254_v0 = vmov 0   ;;  %v29_v1 = vld [vmem:[%s290_s0 + $0x8] sm:$0xff]  ;;  %v66_v2 = vld [vmem:[#allocation2 + $0x78] sm:$0xff]  ;;  %v30_v35 = vlaneseq  ;;  %v255_v39 = vmov 1.0  }
   0x7   :  { %198 = vset.pattern.permute.xlu0 %v254_v0  ;;  %160 = vmatpush.msra.mxu2 %v66_v2  ;;  %v82_v3 = vld [vmem:[#allocation2 + $0xf8] sm:$0xff]  ;;  %v65_v4 = vld [vmem:[#allocation2 + $0x70] sm:$0xff]  ;;  %v64_v6 = vld [vmem:[#allocation2 + $0x68] sm:$0xff]  ;;  %s139_s22 = sshll.u32 %s292_s2, 4  ;;  %s140_s22 = int_to_ptr.hbm [resolvable:$true] %s139_s22 }
   0x8   :  { %37 = vperm.xlu0 %198, %v29_v1   ;;  %v81_v5 = vld [vmem:[#allocation2 + $0xf0] sm:$0xff]  ;;  %176 = vmatpush.msra.mxu3 %v82_v3  ;;  %v80_v7 = vld [vmem:[#allocation2 + $0xe8] sm:$0xff]  ;;  %v63_v8 = vld [vmem:[#allocation2 + $0x60] sm:$0xff]  ;;  %v31_v36 = vand.u32 127, %v30_v35 }
   0x9   :  { %83 = vmatpush.msra.mxu0 %v66_v2  ;;  %161 = vmatpush.msra.mxu2 %v65_v4  ;;  %v79_v9 = vld [vmem:[#allocation2 + $0xe0] sm:$0xff]  ;;  %v62_v11 = vld [vmem:[#allocation2 + $0x58] sm:$0xff]  ;;  %v61_v13 = vld [vmem:[#allocation2 + $0x50] sm:$0xff] }
   0xa   :  { %106 = vmatpush.msra.mxu1 %v82_v3  ;;  %177 = vmatpush.msra.mxu3 %v81_v5  ;;  %v28_v10 = vld [vmem:[%s290_s0] sm:$0xff]  ;;  %v78_v12 = vld [vmem:[#allocation2 + $0xd8] sm:$0xff]  ;;  %v77_v14 = vld [vmem:[#allocation2 + $0xd0] sm:$0xff]  ;;  %v32_v37 = vadd.s32 128, %v31_v36  ;;  %s256_s0 = smov [#allocation5]  }
   0xb   :  { %84 = vmatpush.msra.mxu0 %v65_v4  ;;  %162 = vmatpush.msra.mxu2 %v64_v6  ;;  %v60_v15 = vld [vmem:[#allocation2 + $0x48] sm:$0xff]  ;;  %v59_v17 = vld [vmem:[#allocation2 + $0x40] sm:$0xff]  ;;  %v58_v19 = vld [vmem:[#allocation2 + $0x38] sm:$0xff]  ;;  %s137_s19 = sshll.u32 %s256_s0, 4  ;;  %s138_s19 = int_to_ptr.vmem [resolvable:$true] %s137_s19 }
   0xc   :  { %107 = vmatpush.msra.mxu1 %v81_v5  ;;  %178 = vmatpush.msra.mxu3 %v80_v7  ;;  %v76_v16 = vld [vmem:[#allocation2 + $0xc8] sm:$0xff]  ;;  %v75_v18 = vld [vmem:[#allocation2 + $0xc0] sm:$0xff]  ;;  %v74_v20 = vld [vmem:[#allocation2 + $0xb8] sm:$0xff] }
   0xd   :  { %85 = vmatpush.msra.mxu0 %v64_v6  ;;  %163 = vmatpush.msra.mxu2 %v63_v8  ;;  %v57_v21 = vld [vmem:[#allocation2 + $0x30] sm:$0xff]  ;;  %v56_v23 = vld [vmem:[#allocation2 + $0x28] sm:$0xff]  ;;  %v55_v25 = vld [vmem:[#allocation2 + $0x20] sm:$0xff] }
   0xe   :  { %108 = vmatpush.msra.mxu1 %v80_v7  ;;  %179 = vmatpush.msra.mxu3 %v79_v9  ;;  %v73_v22 = vld [vmem:[#allocation2 + $0xb0] sm:$0xff]  ;;  %v72_v24 = vld [vmem:[#allocation2 + $0xa8] sm:$0xff]  ;;  %v71_v26 = vld [vmem:[#allocation2 + $0xa0] sm:$0xff] }
   0xf   :  { %86 = vmatpush.msra.mxu0 %v63_v8  ;;  %164 = vmatpush.msra.mxu2 %v62_v11  ;;  %v54_v27 = vld [vmem:[#allocation2 + $0x18] sm:$0xff]  ;;  %v53_v29 = vld [vmem:[#allocation2 + $0x10] sm:$0xff]  ;;  %v52_v31 = vld [vmem:[#allocation2 + $0x8] sm:$0xff] }
  0x10   :  { %34 = vperm.xlu0 %198, %v28_v10   ;;  %180 = vmatpush.msra.mxu3 %v78_v12  ;;  %v70_v28 = vld [vmem:[#allocation2 + $0x98] sm:$0xff]  ;;  %v69_v30 = vld [vmem:[#allocation2 + $0x90] sm:$0xff]  ;;  %v68_v32 = vld [vmem:[#allocation2 + $0x88] sm:$0xff] }
  0x11   :  { %109 = vmatpush.msra.mxu1 %v79_v9  ;;  %165 = vmatpush.msra.mxu2 %v61_v13  ;;  %v51_v33 = vld [vmem:[#allocation2] sm:$0xff] }
  0x12   :  { %87 = vmatpush.msra.mxu0 %v62_v11  ;;  %181 = vmatpush.msra.mxu3 %v77_v14  ;;  %v67_v34 = vld [vmem:[#allocation2 + $0x80] sm:$0xff] }
  0x13   :  { %110 = vmatpush.msra.mxu1 %v78_v12  ;;  %166 = vmatpush.msra.mxu2 %v60_v15 }
  0x14   :  { %88 = vmatpush.msra.mxu0 %v61_v13  ;;  %182 = vmatpush.msra.mxu3 %v76_v16 }
  0x15   :  { %111 = vmatpush.msra.mxu1 %v77_v14  ;;  %167 = vmatpush.msra.mxu2 %v59_v17 }
  0x16   :  { %89 = vmatpush.msra.mxu0 %v60_v15  ;;  %183 = vmatpush.msra.mxu3 %v75_v18 }
  0x17   :  { %112 = vmatpush.msra.mxu1 %v76_v16  ;;  %168 = vmatpush.msra.mxu2 %v58_v19 }
  0x18   :  { %90 = vmatpush.msra.mxu0 %v59_v17  ;;  %184 = vmatpush.msra.mxu3 %v74_v20 }
  0x19   :  { %113 = vmatpush.msra.mxu1 %v75_v18  ;;  %169 = vmatpush.msra.mxu2 %v57_v21 }
  0x1a   :  { %91 = vmatpush.msra.mxu0 %v58_v19  ;;  %185 = vmatpush.msra.mxu3 %v73_v22 }
  0x1b   :  { %114 = vmatpush.msra.mxu1 %v74_v20  ;;  %170 = vmatpush.msra.mxu2 %v56_v23 }
  0x1c   :  { %92 = vmatpush.msra.mxu0 %v57_v21  ;;  %186 = vmatpush.msra.mxu3 %v72_v24 }
  0x1d   :  { %115 = vmatpush.msra.mxu1 %v73_v22  ;;  %171 = vmatpush.msra.mxu2 %v55_v25 }
  0x1e   :  { %93 = vmatpush.msra.mxu0 %v56_v23  ;;  %187 = vmatpush.msra.mxu3 %v71_v26 }
  0x1f   :  { %116 = vmatpush.msra.mxu1 %v72_v24  ;;  %172 = vmatpush.msra.mxu2 %v54_v27 }
  0x20   :  { %94 = vmatpush.msra.mxu0 %v55_v25  ;;  %188 = vmatpush.msra.mxu3 %v70_v28 }
  0x21   :  { %117 = vmatpush.msra.mxu1 %v71_v26  ;;  %173 = vmatpush.msra.mxu2 %v53_v29 }
  0x22   :  { %95 = vmatpush.msra.mxu0 %v54_v27  ;;  %189 = vmatpush.msra.mxu3 %v69_v30 }
  0x23   :  { %118 = vmatpush.msra.mxu1 %v70_v28  ;;  %174 = vmatpush.msra.mxu2 %v52_v31 }
  0x24   :  { %96 = vmatpush.msra.mxu0 %v53_v29  ;;  %190 = vmatpush.msra.mxu3 %v68_v32 }
  0x25   :  { %119 = vmatpush.msra.mxu1 %v69_v30  ;;  %175 = vmatpush.msra.mxu2 %v51_v33 }
  0x26   :  { %97 = vmatpush.msra.mxu0 %v52_v31  ;;  %191 = vmatpush.msra.mxu3 %v67_v34 }
  0x27   :  { %120 = vmatpush.msra.mxu1 %v68_v32 }
  0x28   :  { %98 = vmatpush.msra.mxu0 %v51_v33 }
  0x29   :  { %121 = vmatpush.msra.mxu1 %v67_v34 }
  0x7a   :  { %v38_v38 = vpop.permute.xlu0 %37 }
  0x7b   :  { %vm41_vm0 = vcmp.eq.s32.totalorder %v38_v38, %v31_v36  ;;  %vm42_vm1 = vcmp.eq.s32.totalorder %v38_v38, %v32_v37 }
  0x7c   :  { %157 = vmatmul.msk.f32.vlgmr.msra.gmra.mxu2 %vm41_vm0, %v255_v39  ;;  %159 = vmatmul.msk.f32.vlgmr.msra.gmra.mxu3 %vm42_vm1, %v255_v39 }
  0x82   :  { %v35_v40 = vpop.permute.xlu0 %34 }
  0x83   :  { %vm39_vm2 = vcmp.eq.s32.totalorder %v35_v40, %v31_v36  ;;  %vm40_vm3 = vcmp.eq.s32.totalorder %v35_v40, %v32_v37 }
  0x84   :  { %156 = vmatmul.msk.f32.vlgmr.msra.gmra.mxu0 %vm39_vm2, %v255_v39  ;;  %158 = vmatmul.msk.f32.vlgmr.msra.gmra.mxu1 %vm40_vm3, %v255_v39 }
  0xff   :  { %v103_v41 = vpop.f32.mrf.mxu2  ;;  %v126_v42 = vpop.f32.mrf.mxu3 }
 0x100   :  { %v127_v43 = vadd.f32 %v126_v42, %v103_v41 }
 0x101   :  { %v100_v44 = vpop.f32.mrf.mxu0  ;;  %v123_v45 = vpop.f32.mrf.mxu1 }
 0x102   :  { %v130_v46 = vmul.f32 11.313708, %v127_v43  ;;  %v124_v47 = vadd.f32 %v123_v45, %v100_v44 }
 0x104   :  { %132 = vst [vmem:[#allocation5 + $0x8] sm:$0xff] %v130_v46  ;;  %v129_v48 = vmul.f32 11.313708, %v124_v47 }
 0x106   :  { %131 = vst [vmem:[#allocation5] sm:$0xff] %v129_v48 }
 0x107   :  { %145 = dma.vmem_to_hbm [thread:$0]  %s138_s19, 256, %s140_s22, [#allocation4], %s252_s14, %s252_s14, %s253_s15  }
 0x108   :  { %249 = dma.done.wait [#allocation4], 256  }
 0x109   :  { %250 = vsyncadd [#allocation4], 4294967040 }
 0x10a   :  { %150 = vsyncpa [#allocation3], 1 }
 0x10b   :  { %151 = vsyncpa [#allocation4], 1 }

</bundles_post_ra>
